<compile_context>
chip_gen: v7x
topology: tpu7x:2x2x1
jax: 0.10.0
libtpu: 0.0.40
codegen_flags: <defaults>
</compile_context>

<pallas_src>
import functools
import math

import jax
import jax.numpy as jnp
from jax import lax
from jax.experimental import pallas as pl
from jax.experimental.pallas import tpu as pltpu


def _round_up(x, m):
    return (x + m - 1) // m * m


def _largest_divisor_leq(n, cap):
    cap = max(1, min(n, cap))
    for d in range(cap, 0, -1):
        if n % d == 0:
            return d
    return 1


# ---------------- Pallas fused-ops kernel -----------------------------------
def _fused_kernel(bias_ref, y_ref, o_ref, *, tanh1_scale):
    # bias_ref: (1,) f32 scalar prefetch (SMEM) = mean(conv_bias) + bias[0]
    # y_ref:    (1, TR, 128) f32 VMEM block (channel mean already folded into conv)
    # o_ref:    (1, TR, 128) f32 VMEM block
    val = y_ref[...] + bias_ref[0]
    e = jnp.exp(val)
    softmax = e / e            # 1.0, or NaN on exp over/underflow (reference semantics)
    # tanh(softmax)*scale == tanh(1)*scale (constant) except where softmax is NaN,
    # in which case the reference also produces NaN (tanh(NaN)*scale) -> propagate it.
    o_ref[...] = jnp.where(jnp.isnan(softmax), softmax, tanh1_scale)


def fused_pointwise(y_bs, bias_total, scale, *, max_tile_lanes=131072):
    """Elementwise (degenerate softmax + tanh + scale) over a (B, S) f32 tensor."""
    B, S = y_bs.shape

    s_pad = _round_up(S, 1024)           # whole (8,128) f32 vregs; waste < 1024 lanes
    n_blocks = s_pad // 1024
    d = _largest_divisor_leq(n_blocks, max_tile_lanes // 1024)
    # v7x has 2 TensorCores: if B == 1, split the spatial axis so the grid has >= 2
    # parallel programs.
    if B == 1 and d == n_blocks and n_blocks > 1:
        d = _largest_divisor_leq(n_blocks, n_blocks // 2)
    ts = d * 1024
    rows = s_pad // 128
    tr = ts // 128

    x = y_bs.astype(jnp.float32)
    if s_pad != S:
        # Zero-padded lanes see val = bias_total (finite, or NaN if bias is extreme);
        # there is no cross-lane reduction and they are sliced off below, so valid
        # outputs are unaffected.
        x = jnp.pad(x, ((0, 0), (0, s_pad - S)))
    x3 = x.reshape(B, rows, 128)         # lane-dense layout: (..., rows, 128)

    grid = (B, s_pad // ts)
    cost = pl.CostEstimate(
        flops=3 * B * s_pad,
        transcendentals=B * s_pad,
        bytes_accessed=4 * (2 * B * s_pad + 1),
    )
    tanh1_scale = math.tanh(1.0) * float(scale)

    out = pl.pallas_call(
        functools.partial(_fused_kernel, tanh1_scale=tanh1_scale),
        out_shape=jax.ShapeDtypeStruct((B, rows, 128), jnp.float32),
        grid_spec=pltpu.PrefetchScalarGridSpec(
            num_scalar_prefetch=1,                     # scalar bias lives in SMEM
            grid=grid,
            in_specs=[pl.BlockSpec((1, tr, 128), lambda b, s, bias: (b, s, 0))],
            out_specs=pl.BlockSpec((1, tr, 128), lambda b, s, bias: (b, s, 0)),
        ),
        compiler_params=pltpu.CompilerParams(
            dimension_semantics=("parallel", "parallel"),
            vmem_limit_bytes=32 * 1024 * 1024,
        ),
        cost_estimate=cost,
    )(bias_total, x3)

    return out.reshape(B, s_pad)[:, :S]


# ---------------- ConvTranspose3d with folded channel mean (XLA glue) --------
# TODO(synk): the transposed conv itself stays on XLA's conv (NDHWC/DHWIO); a
# hand-written Pallas MXU kernel could fuse it with the pointwise pass entirely.
def conv_transpose3d_channel_mean(x, weight, conv_bias_unused, stride, padding):
    """mean over Cout of ConvTranspose3d(x) (without bias), as a Cout'=1 forward conv.

    x: (B, Cin, D, H, W); weight (PyTorch layout): (Cin, Cout, k, k, k).
    Returns (B, D', H', W', 1) in NDHWC. mean(conv_bias) is added later (in-kernel),
    using   mean_o( sum_i x*w[i,o] + b[o] ) == sum_i x*mean_o(w[i,o]) + mean(b).
    """
    k = weight.shape[2]
    pad = k - 1 - padding
    x_ndhwc = jnp.transpose(x, (0, 2, 3, 4, 1))
    # equivalent forward conv: swap in/out channels, flip spatial taps,
    # dilate the input by `stride`, pad by (k - 1 - padding); then mean over O.
    w_dhwio = jnp.transpose(weight, (2, 3, 4, 0, 1))[::-1, ::-1, ::-1]
    w_mean = jnp.mean(w_dhwio, axis=4, keepdims=True)       # (k,k,k,Cin,1)
    y = lax.conv_general_dilated(
        x_ndhwc, w_mean,
        window_strides=(1, 1, 1),
        padding=[(pad, pad)] * 3,
        lhs_dilation=(stride, stride, stride),
        dimension_numbers=("NDHWC", "DHWIO", "NDHWC"),
    )
    return y                                                 # (B, D', H', W', 1)


# ---------------- full model forward -----------------------------------------
def model_forward(x, conv_w, conv_b, bias, scale, stride, padding):
    y = conv_transpose3d_channel_mean(x, conv_w, conv_b, stride, padding)
    B, Do, Ho, Wo, _ = y.shape
    S = Do * Ho * Wo
    y_bs = y.reshape(B, S)
    bias_total = (jnp.mean(conv_b.astype(jnp.float32))
                  + jnp.asarray(bias, jnp.float32).reshape(-1)[0]).reshape(1)
    out = fused_pointwise(y_bs, bias_total, scale)
    return out.reshape(B, 1, Do, Ho, Wo)


# ---------------- pure-JAX reference (original module semantics) -------------
def ref_forward(x, conv_w, conv_b, bias, scale, stride, padding):
    k = conv_w.shape[2]
    pad = k - 1 - padding
    x_ndhwc = jnp.transpose(x, (0, 2, 3, 4, 1))
    w_dhwio = jnp.transpose(conv_w, (2, 3, 4, 0, 1))[::-1, ::-1, ::-1]
    y = lax.conv_general_dilated(
        x_ndhwc, w_dhwio, (1, 1, 1), [(pad, pad)] * 3,
        lhs_dilation=(stride, stride, stride),
        dimension_numbers=("NDHWC", "DHWIO", "NDHWC"))
    y = y + conv_b.reshape(1, 1, 1, 1, -1)
    y = jnp.transpose(y, (0, 4, 1, 2, 3))                    # NCDHW
    mean = jnp.mean(y, axis=1, keepdims=True)
    val = mean + bias.reshape(-1)[0]
    e = jnp.exp(val)
    return jnp.tanh(e / e) * scale


if __name__ == "__main__":
    # Hyperparameters (consistent with the PyTorch module's __init__)
    in_channels, out_channels = 8, 16
    kernel_size, stride, padding = 3, 2, 1
    bias_shape = (1, 1, 1, 1, 1)
    scaling_factor = 2.0

    B, D, H, W = 2, 8, 8, 8

    key = jax.random.PRNGKey(0)
    k_x, k_w, k_b, k_bias = jax.random.split(key, 4)

    x = jax.random.normal(k_x, (B, in_channels, D, H, W), dtype=jnp.float32)
    conv_w = jax.random.normal(
        k_w, (in_channels, out_channels, kernel_size, kernel_size, kernel_size),
        dtype=jnp.float32) * 0.1
    conv_b = jax.random.normal(k_b, (out_channels,), dtype=jnp.float32) * 0.1
    bias = jax.random.normal(k_bias, bias_shape, dtype=jnp.float32)

    fwd = jax.jit(model_forward, static_argnames=("scale", "stride", "padding"))
    out = jax.block_until_ready(
        fwd(x, conv_w, conv_b, bias,
            scale=scaling_factor, stride=stride, padding=padding))

    ref = ref_forward(x, conv_w, conv_b, bias, scaling_factor, stride, padding)

    d_out = (D - 1) * stride - 2 * padding + kernel_size
    assert out.shape == (B, 1, d_out, d_out, d_out), out.shape
    assert jnp.allclose(out, ref, atol=1e-5), "mismatch vs reference"

    print("KERNEL_OK")
</pallas_src>

<mosaic_0001>
module attributes {stable_mosaic.version = 11 : i64} {
  func.func @_fused_kernel(%arg0: i32, %arg1: i32, %arg2: memref<1xf32, #tpu.memory_space<smem>>, %arg3: memref<1x32x128xf32, #tpu.memory_space<vmem>>, %arg4: memref<1x32x128xf32, #tpu.memory_space<vmem>>) attributes {dimension_semantics = [#tpu.dimension_semantics<parallel>, #tpu.dimension_semantics<parallel>], iteration_bounds = array<i64: 2, 1>, scalar_prefetch = 1 : i64, scratch_operands = 0 : i64, tpu.core_type = #tpu.core_type<tc>, window_params = [{transform_indices = @transform_0, window_bounds = array<i64: 1, 32, 128>}, {transform_indices = @transform_1, window_bounds = array<i64: 1, 32, 128>}]} {
    %c0 = arith.constant 0 : index
    %c0_0 = arith.constant 0 : index
    %c0_1 = arith.constant 0 : index
    %0 = vector.load %arg3[%c0, %c0_0, %c0_1] : memref<1x32x128xf32, #tpu.memory_space<vmem>>, vector<1x32x128xf32>
    %c0_2 = arith.constant 0 : index
    %1 = memref.load %arg2[%c0_2] : memref<1xf32, #tpu.memory_space<smem>>
    %2 = vector.broadcast %1 : f32 to vector<1x32x128xf32>
    %3 = arith.addf %0, %2 : vector<1x32x128xf32>
    %4 = math.exp %3 : vector<1x32x128xf32>
    %5 = arith.divf %4, %4 : vector<1x32x128xf32>
    %6 = arith.cmpf one, %5, %5 : vector<1x32x128xf32>
    %cst = arith.constant 1.52318835 : f32
    %7 = vector.broadcast %cst : f32 to vector<1x32x128xf32>
    %8 = arith.select %6, %5, %7 : vector<1x32x128xi1>, vector<1x32x128xf32>
    %c0_3 = arith.constant 0 : index
    %c0_4 = arith.constant 0 : index
    %c0_5 = arith.constant 0 : index
    %9 = vector.load %arg4[%c0_3, %c0_4, %c0_5] : memref<1x32x128xf32, #tpu.memory_space<vmem>>, vector<1x32x128xf32>
    tpu.vector_store %arg4[%c0_3, %c0_4, %c0_5], %8 {strides = array<i32>} : memref<1x32x128xf32, #tpu.memory_space<vmem>>, vector<1x32x128xf32>,
    return
  }
  func.func @transform_0(%arg0: i32, %arg1: i32, %arg2: memref<1xf32, #tpu.memory_space<smem>>) -> (i32, i32, i32) {
    %c0_i32 = arith.constant 0 : i32
    %c0_i32_0 = arith.constant 0 : i32
    return %arg0, %arg1, %c0_i32 : i32, i32, i32
  }
  func.func @transform_1(%arg0: i32, %arg1: i32, %arg2: memref<1xf32, #tpu.memory_space<smem>>) -> (i32, i32, i32) {
    %c0_i32 = arith.constant 0 : i32
    %c0_i32_0 = arith.constant 0 : i32
    return %arg0, %arg1, %c0_i32 : i32, i32, i32
  }
}

</mosaic_0001>

<bundles_post_ra>
// kernel: model_forward.1
= control target key start
LH: loop header
LB: loop body
LE: loop exit
PB: predicated region body
PF: predicated region fallthrough
CT: control target
= control target key end

     0   :  { %s378_s11 = smov 0   ;;  %s380_s12 = smov 0   ;;  %s418_s0 = inlined_call_operand.<no memory space> [shape: f32[1], index: 0, kind: input, shape index: {}]   ;;  %s419_s1 = inlined_call_operand.vmem [shape: f32[2,32,128], index: 1, kind: input, shape index: {}]   ;;  %s420_s2 = inlined_call_operand.vmem [shape: f32[2,32,128], index: 2, kind: output, shape index: {}]  }
   0x1   :  { %7 = sst [smem:[#allocation3]] %s418_s0  ;;  %s382_s13 = smov 0  }
   0x2 LB: > { %s25_s0 = sadd.s32 1, %s354_s12  ;;  %p287_p0 = scmp.ge.s32.totalorder %s358_s13, 1  ;;  %s358_s13 = sphi %s382_s13, %s13_s13   ;;  %s354_s12 = sphi %s380_s12, %s422_s12   ;;  %s350_s11 = sphi %s378_s11, %s421_s11  }
   0x3   : > { %p27_p1 = scmp.ge.s32.totalorder %s25_s0, 2  ;;  %p110_p2 = scmp.lt.s32.totalorder %s358_s13, 3 }
   0x5   : > { %s424_s0 = smov (%p27_p1, %s25_s0), 0  ;;  %p111_p3 = pnand %p287_p0, %p110_p2 }
   0x6   : > { %p139_p4 = scmp.lt.s32.totalorder (!%p111_p3), %s350_s11, 1  ;;  %s162_s14 = sld [smem:[#allocation3]] (!%p111_p3) }
   0x7   : > { %114 = sbr.rel (%p111_p3) target bundleno = 52 (0x34), region = 24 }
   0xc   : > { %v163_v3 = vstv (!%p111_p3), %s162_s14 }
   0xe   : > { %s426_s11 = smov (!%p139_p4, %s350_s11), 1 }
   0xf   : > { %s294_s15 = sshll.u32 %s426_s11, 5 }
  0x10   : > { %s146_s18 = scalar_lea.vmem %s419_s1, %s294_s15  ;;  %s156_s21 = scalar_lea.vmem %s420_s2, %s294_s15 }
  0x11   : > { %v158_v0 = vld [vmem:[%s146_s18] sm:$0xff]  ;;  %v159_v1 = vld [vmem:[%s146_s18 + $0x8] sm:$0xff]  ;;  %v160_v2 = vld [vmem:[%s146_s18 + $0x10] sm:$0xff] }
  0x12   : > { %v161_v4 = vld [vmem:[%s146_s18 + $0x18] sm:$0xff]  ;;  %v164_v5 = vadd.f32 %v163_v3, %v158_v0  ;;  %v165_v6 = vadd.f32 %v163_v3, %v159_v1  ;;  %v166_v7 = vadd.f32 %v163_v3, %v160_v2 }
  0x13   : > { %v167_v8 = vadd.f32 %v163_v3, %v161_v4 }
  0x14   : > { %v168_v9 = vmul.f32 1.442695, %v164_v5  ;;  %v170_v10 = vmul.f32 1.442695, %v165_v6  ;;  %v172_v11 = vmul.f32 1.442695, %v166_v7 }
  0x15   : > { %v174_v12 = vmul.f32 1.442695, %v167_v8 }
  0x16   : > { %320 = vpow2.f32 %v168_v9 }
  0x17   : > { %322 = vpow2.f32 %v170_v10 }
  0x18   : > { %324 = vpow2.f32 %v172_v11 }
  0x19   : > { %326 = vpow2.f32 %v174_v12 }
  0x20   : > { %v321_v13 = vpop.eup %320 }
  0x21   : > { %v323_v14 = vpop.eup %322  ;;  %328 = vrcp.f32 %v321_v13 }
  0x22   : > { %v325_v15 = vpop.eup %324  ;;  %330 = vrcp.f32 %v323_v14 }
  0x23   : > { %v327_v16 = vpop.eup %326  ;;  %332 = vrcp.f32 %v325_v15 }
  0x24   : > { %334 = vrcp.f32 %v327_v16 }
  0x2b   : > { %v329_v17 = vpop.eup %328 }
  0x2c   : > { %v331_v18 = vpop.eup %330  ;;  %v177_v19 = vmul.f32 %v329_v17, %v321_v13 }
  0x2d   : > { %v333_v20 = vpop.eup %332  ;;  %v179_v21 = vmul.f32 %v331_v18, %v323_v14 }
  0x2e   : > { %v335_v22 = vpop.eup %334  ;;  %vm184_vm0 = vcmp.ne.f32.partialorder %v177_v19, %v177_v19  ;;  %v181_v23 = vmul.f32 %v333_v20, %v325_v15 }
  0x2f   : > { %v188_v24 = vsel %vm184_vm0, %v177_v19, 1.5231884  ;;  %vm185_vm1 = vcmp.ne.f32.partialorder %v179_v21, %v179_v21  ;;  %v183_v25 = vmul.f32 %v335_v22, %v327_v16 }
  0x30   : > { %192 = vst [vmem:[%s156_s21] sm:$0xff] %v188_v24  ;;  %v189_v26 = vsel %vm185_vm1, %v179_v21, 1.5231884  ;;  %vm186_vm2 = vcmp.ne.f32.partialorder %v181_v23, %v181_v23 }
  0x31   : > { %193 = vst [vmem:[%s156_s21 + $0x8] sm:$0xff] %v189_v26  ;;  %v190_v27 = vsel %vm186_vm2, %v181_v23, 1.5231884  ;;  %vm187_vm3 = vcmp.ne.f32.partialorder %v183_v25, %v183_v25 }
  0x32   : > { %194 = vst [vmem:[%s156_s21 + $0x10] sm:$0xff] %v190_v27  ;;  %v191_v28 = vsel %vm187_vm3, %v183_v25, 1.5231884 }
  0x33   : > { %195 = vst [vmem:[%s156_s21 + $0x18] sm:$0xff] %v191_v28 }
  0x34 PF: > { %s13_s13 = sadd.s32 1, %s358_s13   ;;  %s421_s11 = smov %s354_s12 }
  0x35   : > { %p10_p5 = scmp.ge.s32.totalorder %s13_s13, 4   ;;  %s422_s12 = smov %s424_s0 }
  0x37   :  { %12 = sbr.rel (!%p10_p5) target bundleno = 2 (0x2), region = 54 }

</bundles_post_ra>
